<compile_context>
chip_gen: v5e
topology: v5e:2x2
jax: 0.10.0
libtpu: 0.0.40
codegen_flags: <defaults>
</compile_context>

<pallas_src>
import functools

import jax
import jax.numpy as jnp
from jax import lax
from jax.experimental import pallas as pl
from jax.experimental.pallas import tpu as pltpu


def _vmem_capacity_bytes():
    """Per-core VMEM capacity; conservative 64 MiB (v7x) fallback."""
    try:
        cap = getattr(pltpu.get_tpu_info(), "vmem_capacity_bytes", None)
        if cap:
            return int(cap)
    except Exception:
        pass
    return 64 * 1024 * 1024


def _default_num_splits():
    """Batch splits for the 'parallel' grid axis (TensorCores per chip)."""
    try:
        n = getattr(jax.devices()[0], "num_cores", None)
        return max(1, min(int(n), 8)) if n else 1
    except Exception:
        return 1


def _svdd_subspace_kernel(r2_ref, x_ref, pm_ref, out_ref, acc_ref, *,
                          soft_boundary, total_b, block_b, inner_steps, has_tail):
    c = pl.program_id(0)          # batch split (parallel across TensorCores)
    i = pl.program_id(1)          # row-tile step within the split (accumulation axis)

    @pl.when(i == 0)
    def _init():
        acc_ref[...] = jnp.zeros_like(acc_ref)

    # residual = x @ (I - P)^T, straight off the MXU in f32 (identity folded in the
    # wrapper; contracting dim 1 of both operands avoids any in-kernel transpose).
    resid = lax.dot_general(x_ref[...], pm_ref[...], (((1,), (1,)), ((), ())),
                            preferred_element_type=jnp.float32)
    dist = jnp.sum(resid * resid, axis=1, keepdims=True)          # (tb, 1) f32

    if soft_boundary:
        contrib = jnp.maximum(dist - r2_ref[0, 0], 0.0)
    else:
        contrib = dist

    if has_tail:
        # Cheap (tb, 1)-level mask for padded / clamped tiles; statically removed
        # when the grid covers the batch exactly.
        base = (c * inner_steps + i) * block_b
        row = base + lax.broadcasted_iota(jnp.int32, (block_b, 1), 0)
        contrib = jnp.where(row < total_b, contrib, 0.0)

    # Per-row accumulation (pure VPU add); cross-row reduce deferred to finalize.
    acc_ref[...] += contrib

    @pl.when(i == pl.num_programs(1) - 1)
    def _finalize():
        out_ref[...] = jnp.sum(acc_ref[...], keepdims=True).reshape(1, 1, 1)


def deep_svdd_loss_subspace(x, P, R, *, nu, eps=1e-6, soft_boundary=False,
                            num_splits=None, max_rows_per_block=2048):
    """Pallas implementation of DeepSVDDLossSubspace.forward.

    x : (B, M) embedded points, P : (M, M) projection matrix, R : radius (python
    float or traced scalar).  Returns a scalar float32 loss.
    """
    del eps  # unused in the reference forward pass
    B, M = x.shape
    assert P.shape == (M, M)

    x_item = jnp.dtype(x.dtype).itemsize
    sub = max(8, 32 // x_item)                    # dtype-aware sublane multiple

    # Fold the identity once: x - x @ P^T == x @ (I - P)^T.  (For bf16 inputs the
    # diagonal of I - P is rounded to bf16, matching MXU-native feeding.)
    pm = (jnp.eye(M, dtype=jnp.float32) - P.astype(jnp.float32)).astype(x.dtype)
    pm_item = jnp.dtype(pm.dtype).itemsize

    # ---- batch split across TensorCores (v7x megacore; 1 split on v5e/v6e) ----
    n_splits = _default_num_splits() if num_splits is None else int(num_splits)
    n_splits = max(1, min(n_splits, 8))
    n_splits = min(n_splits, max(1, pl.cdiv(B, sub)))   # don't split tiny batches

    # ---- VMEM-aware tile sizing ----
    cap = _vmem_capacity_bytes()
    budget = (cap * 3) // 4                        # headroom for Mosaic internals
    p_bytes = 2 * M * M * pm_item                  # P budgeted double-buffered
    per_row = 2 * M * x_item + 2 * M * 4           # dbl-buffered x tile + f32 temps
    avail = budget - p_bytes - (2 << 20)
    if avail >= per_row * sub:
        tb = min(avail // per_row, int(max_rows_per_block))
        tb = max(sub, (tb // sub) * sub)
    else:
        tb = sub
        # TODO(synk): for very large M (P ~ VMEM budget) stream P in column blocks
        # over an extra grid axis instead of keeping it fully resident.

    rows_per_split = pl.cdiv(B, n_splits)
    if n_splits == 1 and B <= tb:
        tb = B                                     # single full block, no masking
    else:
        tb = min(tb, max(sub, pl.cdiv(rows_per_split, sub) * sub))

    n_blocks = pl.cdiv(B, tb)
    n_splits = min(n_splits, n_blocks)
    inner = pl.cdiv(n_blocks, n_splits)
    has_tail = (n_splits * inner * tb != B)

    # x block index for split c, step i (clamped when splits divide unevenly; the
    # duplicated rows of clamped steps are zeroed by the tail mask).
    if n_splits * inner == n_blocks:
        x_map = lambda c, i: (c * inner + i, 0)
    else:
        x_map = lambda c, i: (jnp.minimum(c * inner + i, n_blocks - 1), 0)

    vmem_need = p_bytes + per_row * tb + tb * 512 + (4 << 20)
    vmem_limit = int(min(cap, max(vmem_need, 32 << 20)))

    r2 = jnp.asarray(R, jnp.float32) ** 2          # works for python floats and traced R
    r2_arr = r2.reshape(1, 1)

    kernel = functools.partial(
        _svdd_subspace_kernel,
        soft_boundary=bool(soft_boundary),
        total_b=B, block_b=tb, inner_steps=inner, has_tail=has_tail)

    cost = pl.CostEstimate(
        flops=2 * B * M * M + 3 * B * M,
        transcendentals=0,
        bytes_accessed=B * M * x_item + M * M * pm_item + 4 * n_splits + 4)

    partials = pl.pallas_call(
        kernel,
        out_shape=jax.ShapeDtypeStruct((n_splits, 1, 1), jnp.float32),
        grid_spec=pltpu.PrefetchScalarGridSpec(
            num_scalar_prefetch=0,
            grid=(n_splits, inner),
            in_specs=[
                pl.BlockSpec(memory_space=pltpu.MemorySpace.SMEM),  # R**2 scalar
                pl.BlockSpec((tb, M), x_map),                       # x tile (pipelined)
                pl.BlockSpec((M, M), lambda c, i: (0, 0)),          # (I - P) resident
            ],
            out_specs=pl.BlockSpec((1, 1, 1), lambda c, i: (c, 0, 0)),
            scratch_shapes=[pltpu.VMEM((tb, 1), jnp.float32)]),
        compiler_params=pltpu.CompilerParams(
            dimension_semantics=("parallel", "arbitrary"),
            vmem_limit_bytes=vmem_limit),
        cost_estimate=cost,
    )(r2_arr, x, pm)

    mean_term = jnp.sum(partials) / B
    if soft_boundary:
        return r2 + (1.0 / nu) * mean_term
    return mean_term


def _reference(x, P, R, *, nu, soft_boundary=False):
    """Pure-JAX reference mirroring the PyTorch module."""
    x = x.astype(jnp.float32)
    P = P.astype(jnp.float32)
    dist = jnp.sum((x - jnp.matmul(P, x.T).T) ** 2, axis=1)
    if soft_boundary:
        return R ** 2 + (1.0 / nu) * jnp.mean(jnp.maximum(0.0, dist - R ** 2))
    return jnp.mean(dist)


if __name__ == "__main__":
    key = jax.random.PRNGKey(0)
    k_x, k_v = jax.random.split(key)

    B, M, K = 40, 128, 32   # batch, embedding dim, subspace rank (small demo)
    nu = 0.1
    R = 0.5

    x = jax.random.normal(k_x, (B, M), dtype=jnp.float32)
    V = jax.random.normal(k_v, (M, K), dtype=jnp.float32)
    Q, _ = jnp.linalg.qr(V)
    P = Q @ Q.T            # projection onto a K-dim subspace

    ref_hard = _reference(x, P, R, nu=nu, soft_boundary=False)
    ref_soft = _reference(x, P, R, nu=nu, soft_boundary=True)

    # 1) Auto-sized (single large tile) hard-boundary path.
    loss = jax.block_until_ready(
        deep_svdd_loss_subspace(x, P, R, nu=nu, soft_boundary=False))
    assert jnp.allclose(loss, ref_hard, rtol=1e-5, atol=1e-5), (loss, ref_hard)

    # 2) Tiled path with a masked partial tile (forced small blocks).
    loss_t = jax.block_until_ready(
        deep_svdd_loss_subspace(x, P, R, nu=nu, soft_boundary=False,
                                max_rows_per_block=16))
    assert jnp.allclose(loss_t, ref_hard, rtol=1e-5, atol=1e-5), (loss_t, ref_hard)

    # 3) Soft boundary, tiled + two-way core split (parallel axis, clamped blocks).
    loss_s = jax.block_until_ready(
        deep_svdd_loss_subspace(x, P, R, nu=nu, soft_boundary=True,
                                max_rows_per_block=16, num_splits=2))
    assert jnp.allclose(loss_s, ref_soft, rtol=1e-5, atol=1e-5), (loss_s, ref_soft)

    # 4) jit with a traced radius (R updated per epoch: no float(R), no recompile).
    jit_loss = jax.jit(functools.partial(deep_svdd_loss_subspace, nu=nu,
                                         soft_boundary=True, max_rows_per_block=16))
    loss_j = jax.block_until_ready(jit_loss(x, P, jnp.float32(R)))
    assert jnp.allclose(loss_j, ref_soft, rtol=1e-5, atol=1e-5), (loss_j, ref_soft)

    # 5) bf16 inputs feed the MXU natively (looser tolerance; I-P diag rounded to bf16).
    loss_bf = jax.block_until_ready(
        deep_svdd_loss_subspace(x.astype(jnp.bfloat16), P.astype(jnp.bfloat16), R,
                                nu=nu, soft_boundary=False, max_rows_per_block=16))
    assert jnp.allclose(loss_bf, ref_hard, rtol=2e-2, atol=2e-2), (loss_bf, ref_hard)

    print("KERNEL_OK")
</pallas_src>

<mosaic_0001>
module attributes {stable_mosaic.version = 11 : i64} {
  func.func @_svdd_subspace_kernel(%arg0: i32, %arg1: i32, %arg2: memref<1x1xf32, #tpu.memory_space<smem>>, %arg3: memref<40x128xf32, #tpu.memory_space<vmem>>, %arg4: memref<128x128xf32, #tpu.memory_space<vmem>>, %arg5: memref<1x1x1xf32, #tpu.memory_space<vmem>>, %arg6: memref<40x1xf32, #tpu.memory_space<vmem>>) attributes {dimension_semantics = [#tpu.dimension_semantics<parallel>, #tpu.dimension_semantics<arbitrary>], iteration_bounds = array<i64: 1, 1>, scalar_prefetch = 0 : i64, scratch_operands = 1 : i64, tpu.core_type = #tpu.core_type<tc>, window_params = [{transform_indices = @transform_0, window_bounds = array<i64: 1, 1>}, {transform_indices = @transform_1, window_bounds = array<i64: 40, 128>}, {pipeline_mode = #tpu.pipeline_mode<synchronous>, transform_indices = @transform_2, window_bounds = array<i64: 128, 128>}, {transform_indices = @transform_3, window_bounds = array<i64: 1, 1, 1>}]} {
    %c0_i32 = arith.constant 0 : i32
    %0 = arith.cmpi eq, %arg1, %c0_i32 : i32
    %1 = arith.extui %0 : i1 to i32
    %c0_i32_0 = arith.constant 0 : i32
    %2 = arith.cmpi ne, %1, %c0_i32_0 : i32
    scf.if %2 {
      %cst_11 = arith.constant 0.000000e+00 : f32
      %15 = vector.broadcast %cst_11 : f32 to vector<40x1xf32>
      %c0_12 = arith.constant 0 : index
      %c0_13 = arith.constant 0 : index
      %16 = vector.load %arg6[%c0_12, %c0_13] : memref<40x1xf32, #tpu.memory_space<vmem>>, vector<40x1xf32>
      tpu.vector_store %arg6[%c0_12, %c0_13], %15 {strides = array<i32>} : memref<40x1xf32, #tpu.memory_space<vmem>>, vector<40x1xf32>,
    } else {
    }
    %c0 = arith.constant 0 : index
    %c0_1 = arith.constant 0 : index
    %3 = vector.load %arg3[%c0, %c0_1] : memref<40x128xf32, #tpu.memory_space<vmem>>, vector<40x128xf32>
    %c0_2 = arith.constant 0 : index
    %c0_3 = arith.constant 0 : index
    %4 = vector.load %arg4[%c0_2, %c0_3] : memref<128x128xf32, #tpu.memory_space<vmem>>, vector<128x128xf32>
    %cst = arith.constant dense<0.000000e+00> : vector<40x128xf32>
    %5 = tpu.matmul %3, %4, %cst {dimension_numbers = #tpu.dot_dimension_numbers<[1], [1], [0], [0], [0, 0, 1, 0], [], []>} : vector<40x128xf32>, vector<128x128xf32>, vector<40x128xf32> -> vector<40x128xf32>
    %6 = arith.mulf %5, %5 : vector<40x128xf32>
    %cst_4 = arith.constant dense<0.000000e+00> : vector<40xf32>
    %7 = vector.multi_reduction <add>, %6, %cst_4 [1] : vector<40x128xf32> to vector<40xf32>
    %8 = vector.shape_cast %7 : vector<40xf32> to vector<40x1xf32>
    %c0_5 = arith.constant 0 : index
    %c0_6 = arith.constant 0 : index
    %9 = vector.load %arg6[%c0_5, %c0_6] : memref<40x1xf32, #tpu.memory_space<vmem>>, vector<40x1xf32>
    %10 = arith.addf %9, %8 : vector<40x1xf32>
    %c0_7 = arith.constant 0 : index
    %c0_8 = arith.constant 0 : index
    %11 = vector.load %arg6[%c0_7, %c0_8] : memref<40x1xf32, #tpu.memory_space<vmem>>, vector<40x1xf32>
    tpu.vector_store %arg6[%c0_7, %c0_8], %10 {strides = array<i32>} : memref<40x1xf32, #tpu.memory_space<vmem>>, vector<40x1xf32>,
    %c0_i32_9 = arith.constant 0 : i32
    %12 = arith.cmpi eq, %arg1, %c0_i32_9 : i32
    %13 = arith.extui %12 : i1 to i32
    %c0_i32_10 = arith.constant 0 : i32
    %14 = arith.cmpi ne, %13, %c0_i32_10 : i32
    scf.if %14 {
      %c0_11 = arith.constant 0 : index
      %c0_12 = arith.constant 0 : index
      %15 = vector.load %arg6[%c0_11, %c0_12] : memref<40x1xf32, #tpu.memory_space<vmem>>, vector<40x1xf32>
      %16 = vector.shape_cast %15 : vector<40x1xf32> to vector<1x40x1xf32>
      %cst_13 = arith.constant dense<0.000000e+00> : vector<1xf32>
      %17 = vector.multi_reduction <add>, %16, %cst_13 [1, 2] : vector<1x40x1xf32> to vector<1xf32>
      %18 = vector.shape_cast %17 : vector<1xf32> to vector<1x1x1xf32>
      %19 = vector.extract %18[0, 0, 0] : f32 from vector<1x1x1xf32>
      %20 = vector.broadcast %19 : f32 to vector<1x1xf32>
      %21 = vector.shape_cast %20 : vector<1x1xf32> to vector<1x1x1xf32>
      %c0_14 = arith.constant 0 : index
      %c0_15 = arith.constant 0 : index
      %c0_16 = arith.constant 0 : index
      %22 = vector.load %arg5[%c0_14, %c0_15, %c0_16] : memref<1x1x1xf32, #tpu.memory_space<vmem>>, vector<1x1x1xf32>
      tpu.vector_store %arg5[%c0_14, %c0_15, %c0_16], %21 {strides = array<i32>} : memref<1x1x1xf32, #tpu.memory_space<vmem>>, vector<1x1x1xf32>,
    } else {
    }
    return
  }
  func.func @transform_0(%arg0: i32, %arg1: i32) -> (i32, i32) {
    %c0_i32 = arith.constant 0 : i32
    %c0_i32_0 = arith.constant 0 : i32
    %c0_i32_1 = arith.constant 0 : i32
    return %c0_i32, %c0_i32_0 : i32, i32
  }
  func.func @transform_1(%arg0: i32, %arg1: i32) -> (i32, i32) {
    %c1_i32 = arith.constant 1 : i32
    %0 = arith.muli %arg0, %c1_i32 : i32
    %1 = arith.addi %0, %arg1 : i32
    %c0_i32 = arith.constant 0 : i32
    %c0_i32_0 = arith.constant 0 : i32
    return %1, %c0_i32 : i32, i32
  }
  func.func @transform_2(%arg0: i32, %arg1: i32) -> (i32, i32) {
    %c0_i32 = arith.constant 0 : i32
    %c0_i32_0 = arith.constant 0 : i32
    %c0_i32_1 = arith.constant 0 : i32
    return %c0_i32, %c0_i32_0 : i32, i32
  }
  func.func @transform_3(%arg0: i32, %arg1: i32) -> (i32, i32, i32) {
    %c0_i32 = arith.constant 0 : i32
    %c0_i32_0 = arith.constant 0 : i32
    %c0_i32_1 = arith.constant 0 : i32
    return %arg0, %c0_i32, %c0_i32_0 : i32, i32, i32
  }
}

</mosaic_0001>

<bundles_post_ra>
// kernel: tpu_custom_call.1
= control target key start
LH: loop header
LB: loop body
LE: loop exit
PB: predicated region body
PF: predicated region fallthrough
CT: control target
= control target key end

     0   :  { %9 = vsyncpa [#allocation5], 0  ;;  %s379_s0 = inlined_call_operand.<no memory space> [shape: f32[1,1], index: 0, kind: input, shape index: {}]   ;;  %s380_s1 = inlined_call_operand.hbm [shape: f32[40,128], index: 1, kind: input, shape index: {}]   ;;  %s381_s2 = inlined_call_operand.hbm [shape: f32[128,128], index: 2, kind: input, shape index: {}]   ;;  %s382_s3 = inlined_call_operand.hbm [shape: f32[1,1,1], index: 3, kind: output, shape index: {}]  }
   0x1   :  { %10 = vsyncpa [#allocation8], 0 }
   0x2   :  { %11 = vsyncpa [#allocation6], 0  ;;  %s22_s14 = sshll.u32 %s380_s1, 4  ;;  %s329_s15 = smov [#allocation4]   ;;  %s23_s14 = int_to_ptr.hbm [resolvable:$true] %s22_s14 }
   0x3   :  { %s24_s16 = sshll.u32 %s329_s15, 4  ;;  %s35_s18 = sshll.u32 %s381_s2, 4  ;;  %s25_s16 = int_to_ptr.vmem [resolvable:$true] %s24_s16  ;;  %s36_s18 = int_to_ptr.hbm [resolvable:$true] %s35_s18 }
   0x4   :  { %s330_s19 = smov 128   ;;  %s331_s20 = smov 8  }
   0x5   :  { %30 = dma.hbm_to_vmem [thread:$0]  %s23_s14, 640, %s25_s16, [#allocation5], %s330_s19, %s330_s19, %s331_s20  }
   0x6   :  { %s332_s21 = smov [#allocation7]  }
   0x7   :  { %s37_s22 = sshll.u32 %s332_s21, 4  ;;  %s38_s22 = int_to_ptr.vmem [resolvable:$true] %s37_s22 }
   0x8   :  { %43 = dma.hbm_to_vmem [thread:$0]  %s36_s18, 2048, %s38_s22, [#allocation8], %s330_s19, %s330_s19, %s331_s20  }
   0x9   :  { %323 = dma.done.wait [#allocation5], 640  }
   0xa   :  { %324 = vsyncadd [#allocation5], 4294966656 }
   0xb   :  { %325 = dma.done.wait [#allocation8], 2048  }
   0xc   :  { %326 = vsyncadd [#allocation8], 4294965248  ;;  %v84_v0 = vld [vmem:[#allocation7 + $0x78] sm:$0xff]  ;;  %v83_v1 = vld [vmem:[#allocation7 + $0x70] sm:$0xff]  ;;  %vm58_vm0 = vcmask 7168   ;;  %v333_v21 = vmov 0.0  }
   0xd   :  { %85 = vmatpush.xpose.msra.mxu0 %v84_v0  ;;  %196 = vmatpush.xpose.msra.mxu2 %v84_v0  ;;  %v82_v2 = vld [vmem:[#allocation7 + $0x68] sm:$0xff]  ;;  %v81_v3 = vld [vmem:[#allocation7 + $0x60] sm:$0xff]  ;;  %v80_v4 = vld [vmem:[#allocation7 + $0x58] sm:$0xff]  ;;  %59 = vst.msk [vmem:[#allocation2] sm:$0xff] %vm58_vm0, %v333_v21  ;;  %s334_s1 = smov [#allocation9]   ;;  %s184_s25 = sshll.u32 %s382_s3, 4  ;;  %s185_s25 = int_to_ptr.hbm [resolvable:$true] %s184_s25 }
   0xe   :  { %197 = vmatpush.xpose.msra.mxu3 %v84_v0  ;;  %195 = vmatpush.xpose.msra.mxu1 %v84_v0  ;;  %v79_v5 = vld [vmem:[#allocation7 + $0x50] sm:$0xff]  ;;  %v78_v6 = vld [vmem:[#allocation7 + $0x48] sm:$0xff]  ;;  %v77_v7 = vld [vmem:[#allocation7 + $0x40] sm:$0xff]  ;;  %60 = vst.msk [vmem:[#allocation2 + $0x8] sm:$0xff] %vm58_vm0, %v333_v21  ;;  %s182_s2 = sshll.u32 %s334_s1, 4  ;;  %vm175_vm1 = vcmask 0   ;;  %s183_s2 = int_to_ptr.vmem [resolvable:$true] %s182_s2 }
   0xf   :  { %v76_v8 = vld [vmem:[#allocation7 + $0x38] sm:$0xff]  ;;  %v75_v9 = vld [vmem:[#allocation7 + $0x30] sm:$0xff]  ;;  %v74_v10 = vld [vmem:[#allocation7 + $0x28] sm:$0xff]  ;;  %61 = vst.msk [vmem:[#allocation2 + $0x10] sm:$0xff] %vm58_vm0, %v333_v21 }
  0x10   :  { %v73_v11 = vld [vmem:[#allocation7 + $0x20] sm:$0xff]  ;;  %v72_v12 = vld [vmem:[#allocation7 + $0x18] sm:$0xff]  ;;  %v71_v13 = vld [vmem:[#allocation7 + $0x10] sm:$0xff]  ;;  %62 = vst.msk [vmem:[#allocation2 + $0x18] sm:$0xff] %vm58_vm0, %v333_v21 }
  0x11   :  { %86 = vmatpush.xpose.msra.mxu0 %v83_v1  ;;  %199 = vmatpush.xpose.msra.mxu2 %v83_v1  ;;  %v70_v14 = vld [vmem:[#allocation7 + $0x8] sm:$0xff]  ;;  %v69_v15 = vld [vmem:[#allocation7] sm:$0xff]  ;;  %v64_v16 = vld [vmem:[#allocation4] sm:$0xff]  ;;  %63 = vst.msk [vmem:[#allocation2 + $0x20] sm:$0xff] %vm58_vm0, %v333_v21 }
  0x12   :  { %200 = vmatpush.xpose.msra.mxu3 %v83_v1  ;;  %198 = vmatpush.xpose.msra.mxu1 %v83_v1  ;;  %v66_v17 = vld [vmem:[#allocation4 + $0x10] sm:$0xff]  ;;  %v67_v18 = vld [vmem:[#allocation4 + $0x18] sm:$0xff]  ;;  %v65_v19 = vld [vmem:[#allocation4 + $0x8] sm:$0xff] }
  0x13   :  { %v68_v20 = vld [vmem:[#allocation4 + $0x20] sm:$0xff] }
  0x14   :  { %v132_v32 = vld [vmem:[#allocation2] sm:$0xff] }
  0x15   :  { %87 = vmatpush.xpose.msra.mxu0 %v82_v2  ;;  %202 = vmatpush.xpose.msra.mxu2 %v82_v2  ;;  %v133_v37 = vld [vmem:[#allocation2 + $0x8] sm:$0xff] }
  0x16   :  { %203 = vmatpush.xpose.msra.mxu3 %v82_v2  ;;  %201 = vmatpush.xpose.msra.mxu1 %v82_v2  ;;  %v134_v35 = vld [vmem:[#allocation2 + $0x10] sm:$0xff] }
  0x17   :  { %v135_v41 = vld [vmem:[#allocation2 + $0x18] sm:$0xff] }
  0x18   :  { %v136_v42 = vld [vmem:[#allocation2 + $0x20] sm:$0xff] }
  0x19   :  { %88 = vmatpush.xpose.msra.mxu0 %v81_v3  ;;  %205 = vmatpush.xpose.msra.mxu2 %v81_v3 }
  0x1a   :  { %206 = vmatpush.xpose.msra.mxu3 %v81_v3  ;;  %204 = vmatpush.xpose.msra.mxu1 %v81_v3 }
  0x1d   :  { %89 = vmatpush.xpose.msra.mxu0 %v80_v4  ;;  %208 = vmatpush.xpose.msra.mxu2 %v80_v4 }
  0x1e   :  { %209 = vmatpush.xpose.msra.mxu3 %v80_v4  ;;  %207 = vmatpush.xpose.msra.mxu1 %v80_v4 }
  0x21   :  { %90 = vmatpush.xpose.msra.mxu0 %v79_v5  ;;  %211 = vmatpush.xpose.msra.mxu2 %v79_v5 }
  0x22   :  { %212 = vmatpush.xpose.msra.mxu3 %v79_v5  ;;  %210 = vmatpush.xpose.msra.mxu1 %v79_v5 }
  0x25   :  { %91 = vmatpush.xpose.msra.mxu0 %v78_v6  ;;  %214 = vmatpush.xpose.msra.mxu2 %v78_v6 }
  0x26   :  { %215 = vmatpush.xpose.msra.mxu3 %v78_v6  ;;  %213 = vmatpush.xpose.msra.mxu1 %v78_v6 }
  0x29   :  { %92 = vmatpush.xpose.msra.mxu0 %v77_v7  ;;  %217 = vmatpush.xpose.msra.mxu2 %v77_v7 }
  0x2a   :  { %218 = vmatpush.xpose.msra.mxu3 %v77_v7  ;;  %216 = vmatpush.xpose.msra.mxu1 %v77_v7 }
  0x2d   :  { %93 = vmatpush.xpose.msra.mxu0 %v76_v8  ;;  %220 = vmatpush.xpose.msra.mxu2 %v76_v8 }
  0x2e   :  { %221 = vmatpush.xpose.msra.mxu3 %v76_v8  ;;  %219 = vmatpush.xpose.msra.mxu1 %v76_v8 }
  0x31   :  { %94 = vmatpush.xpose.msra.mxu0 %v75_v9  ;;  %223 = vmatpush.xpose.msra.mxu2 %v75_v9 }
  0x32   :  { %224 = vmatpush.xpose.msra.mxu3 %v75_v9  ;;  %222 = vmatpush.xpose.msra.mxu1 %v75_v9 }
  0x35   :  { %95 = vmatpush.xpose.msra.mxu0 %v74_v10  ;;  %226 = vmatpush.xpose.msra.mxu2 %v74_v10 }
  0x36   :  { %227 = vmatpush.xpose.msra.mxu3 %v74_v10  ;;  %225 = vmatpush.xpose.msra.mxu1 %v74_v10 }
  0x39   :  { %96 = vmatpush.xpose.msra.mxu0 %v73_v11  ;;  %229 = vmatpush.xpose.msra.mxu2 %v73_v11 }
  0x3a   :  { %230 = vmatpush.xpose.msra.mxu3 %v73_v11  ;;  %228 = vmatpush.xpose.msra.mxu1 %v73_v11 }
  0x3d   :  { %97 = vmatpush.xpose.msra.mxu0 %v72_v12  ;;  %232 = vmatpush.xpose.msra.mxu2 %v72_v12 }
  0x3e   :  { %233 = vmatpush.xpose.msra.mxu3 %v72_v12  ;;  %231 = vmatpush.xpose.msra.mxu1 %v72_v12 }
  0x41   :  { %98 = vmatpush.xpose.msra.mxu0 %v71_v13  ;;  %235 = vmatpush.xpose.msra.mxu2 %v71_v13 }
  0x42   :  { %236 = vmatpush.xpose.msra.mxu3 %v71_v13  ;;  %234 = vmatpush.xpose.msra.mxu1 %v71_v13 }
  0x45   :  { %99 = vmatpush.xpose.msra.mxu0 %v70_v14  ;;  %238 = vmatpush.xpose.msra.mxu2 %v70_v14 }
  0x46   :  { %239 = vmatpush.xpose.msra.mxu3 %v70_v14  ;;  %237 = vmatpush.xpose.msra.mxu1 %v70_v14 }
  0x49   :  { %100 = vmatpush.xpose.msra.mxu0 %v69_v15  ;;  %241 = vmatpush.xpose.msra.mxu2 %v69_v15 }
  0x4a   :  { %242 = vmatpush.xpose.msra.mxu3 %v69_v15  ;;  %240 = vmatpush.xpose.msra.mxu1 %v69_v15 }
  0x4c   :  { %101 = vmatmul.f32.vlgmr.msra.gmra.mxu0 %v64_v16  ;;  %107 = vmatmul.f32.vlgmr.msra.gmra.mxu2 %v66_v17 }
  0x4d   :  { %110 = vmatmul.f32.vlgmr.msra.gmra.mxu3 %v67_v18  ;;  %104 = vmatmul.f32.vlgmr.msra.gmra.mxu1 %v65_v19 }
  0x55   :  { %113 = vmatmul.f32.gmra.mxu3 %v68_v20 }
  0xc9   :  { %v102_v22 = vpop.f32.mrf.mxu0 }
  0xca   :  { %v117_v23 = vmul.f32 %v102_v22, %v102_v22  ;;  %v105_v24 = vpop.f32.mrf.mxu1 }
  0xcb   :  { %v118_v27 = vmul.f32 %v105_v24, %v105_v24 }
  0xcc   :  { %122 = vadd.xlane.f32.xlu0 %v117_v23 }
  0xcf   :  { %v108_v25 = vpop.f32.mrf.mxu2 }
  0xd0   :  { %v119_v26 = vmul.f32 %v108_v25, %v108_v25  ;;  %v111_v28 = vpop.f32.mrf.mxu3 }
  0xd1   :  { %v120_v29 = vmul.f32 %v111_v28, %v111_v28 }
  0xd2   :  { %126 = vadd.xlane.f32.xlu1 %v119_v26 }
  0xd4   :  { %124 = vadd.xlane.f32.xlu0 %v118_v27 }
  0xd8   :  { %v114_v30 = vpop.f32.mrf.mxu3 }
  0xd9   :  { %v121_v31 = vmul.f32 %v114_v30, %v114_v30 }
  0xda   :  { %128 = vadd.xlane.f32.xlu1 %v120_v29 }
  0xdb   :  { %130 = vadd.xlane.f32.xlu2 %v121_v31 }
 0x13f   :  { %v123_v33 = vpop.xlane.xlu0 %122 }
 0x140   :  { %v137_v34 = vadd.f32 %v132_v32, %v123_v33 }
 0x142   :  { %143 = vst.msk [vmem:[#allocation2] sm:$0xff] %vm58_vm0, %v137_v34 }
 0x145   :  { %v127_v36 = vpop.xlane.xlu1 %126 }
 0x146   :  { %v139_v38 = vadd.f32 %v134_v35, %v127_v36 }
 0x147   :  { %v125_v39 = vpop.xlane.xlu0 %124 }
 0x148   :  { %145 = vst.msk [vmem:[#allocation2 + $0x10] sm:$0xff] %vm58_vm0, %v139_v38  ;;  %v138_v40 = vadd.f32 %v133_v37, %v125_v39 }
 0x149   :  { %v151_v47 = vld [vmem:[#allocation2] sm:$0xff] }
 0x14a   :  { %144 = vst.msk [vmem:[#allocation2 + $0x8] sm:$0xff] %vm58_vm0, %v138_v40  ;;  %v156_v49 = vsel %vm58_vm0, %v151_v47, 0.0 }
 0x14d   :  { %v129_v43 = vpop.xlane.xlu1 %128 }
 0x14e   :  { %v140_v44 = vadd.f32 %v135_v41, %v129_v43  ;;  %v131_v45 = vpop.xlane.xlu2 %130 }
 0x14f   :  { %v141_v46 = vadd.f32 %v136_v42, %v131_v45  ;;  %v153_v51 = vld [vmem:[#allocation2 + $0x10] sm:$0xff] }
 0x150   :  { %146 = vst.msk [vmem:[#allocation2 + $0x18] sm:$0xff] %vm58_vm0, %v140_v44  ;;  %v159_v53 = vsel %vm58_vm0, %v153_v51, 0.0 }
 0x151   :  { %147 = vst.msk [vmem:[#allocation2 + $0x20] sm:$0xff] %vm58_vm0, %v141_v46  ;;  %v152_v48 = vld [vmem:[#allocation2 + $0x8] sm:$0xff] }
 0x152   :  { %v157_v50 = vsel %vm58_vm0, %v152_v48, 0.0 }
 0x153   :  { %v158_v52 = vadd.f32 %v157_v50, %v156_v49 }
 0x155   :  { %v160_v55 = vadd.f32 %v159_v53, %v158_v52 }
 0x157   :  { %v154_v54 = vld [vmem:[#allocation2 + $0x18] sm:$0xff] }
 0x158   :  { %v155_v56 = vld [vmem:[#allocation2 + $0x20] sm:$0xff]  ;;  %v161_v57 = vsel %vm58_vm0, %v154_v54, 0.0 }
 0x159   :  { %v162_v58 = vadd.f32 %v161_v57, %v160_v55  ;;  %v163_v59 = vsel %vm58_vm0, %v155_v56, 0.0 }
 0x15b   :  { %v164_v60 = vadd.f32 %v163_v59, %v162_v58 }
 0x15d   :  { %165 = vadd.xlane.f32.xlu2 %v164_v60 }
 0x1d0   :  { %v166_v61 = vpop.xlane.xlu2 %165 }
 0x1d1   :  { %v167_v62 = vrot.slane %v166_v61, 4 }
 0x1d3   :  { %v168_v63 = vadd.f32 %v167_v62, %v166_v61 }
 0x1d5   :  { %v169_v0 = vrot.slane %v168_v63, 2 }
 0x1d7   :  { %v170_v1 = vadd.f32 %v169_v0, %v168_v63 }
 0x1d9   :  { %v171_v2 = vrot.slane %v170_v1, 1 }
 0x1db   :  { %v172_v3 = vadd.f32 %v171_v2, %v170_v1 }
 0x1dd   :  { %243 = vpush %v172_v3 }
 0x20e   :  { %s244_s26 = spop %243 }
 0x20f   :  { %v174_v4 = vstv %s244_s26 }
 0x210   :  { %176 = vst.msk [vmem:[#allocation9] sm:$0x1] %vm175_vm1, %v174_v4 }
 0x211   :  { %187 = dma.vmem_to_hbm [thread:$0]  %s183_s2, 16, %s185_s25, [#allocation6]  }
 0x212   :  { %327 = dma.done.wait [#allocation6], 16  }
 0x213   :  { %328 = vsyncadd [#allocation6], 4294967280 }
 0x214   :  { %192 = vsyncpa [#allocation5], 1 }
 0x215   :  { %193 = vsyncpa [#allocation8], 1 }
 0x216   :  { %194 = vsyncpa [#allocation6], 1 }

</bundles_post_ra>
